<compile_context>
chip_gen: v7x
topology: tpu7x:2x2x1
jax: 0.10.0
libtpu: 0.0.40
codegen_flags: <defaults>
</compile_context>

<pallas_src>
import jax
import jax.numpy as jnp
from jax.experimental import pallas as pl
from jax.experimental.pallas import tpu as pltpu


_LANE = 128            # vreg lane width (fast axis)
_TILE_ROWS = 2048      # lane-dense tile: (2048, 128) f32 = 1 MiB per block
                       # -> 2 arrays x 2 buffers = 4 MiB, inside the default
                       #    scoped VMEM on v5e (16 MiB) / v6e / v7x (32 MiB).
_TILE_1D = _TILE_ROWS * _LANE   # 1-D fallback block size (elements)


def _identity_kernel(x_ref, o_ref):
    # The reference forward performs no arithmetic: pure pass-through copy.
    o_ref[...] = x_ref[...]


def _copy_whole(arr):
    """Whole-array copy, no grid: zero pipeline overhead for small inputs."""
    return pl.pallas_call(
        _identity_kernel,
        out_shape=jax.ShapeDtypeStruct(arr.shape, arr.dtype),
        in_specs=[pl.BlockSpec(memory_space=pltpu.MemorySpace.VMEM)],
        out_specs=pl.BlockSpec(memory_space=pltpu.MemorySpace.VMEM),
    )(arr)


def _copy_tiled_2d(x2):
    """Tiled lane-dense copy for large (rows, 128) inputs.

    grid = cdiv(rows, _TILE_ROWS): the last block is clipped automatically,
    so no wrapper-side padding and no whole-array-in-VMEM fall-through.
    Caller guarantees rows > _TILE_ROWS, hence grid >= 2 (both v7x TCs used).
    """
    rows, lanes = x2.shape
    grid = (pl.cdiv(rows, _TILE_ROWS),)
    return pl.pallas_call(
        _identity_kernel,
        out_shape=jax.ShapeDtypeStruct(x2.shape, x2.dtype),
        grid=grid,
        in_specs=[pl.BlockSpec((_TILE_ROWS, lanes), lambda i: (i, 0))],
        out_specs=pl.BlockSpec((_TILE_ROWS, lanes), lambda i: (i, 0)),
        compiler_params=pltpu.CompilerParams(
            dimension_semantics=("parallel",),
        ),
    )(x2)


def _copy_tiled_1d(flat):
    """1-D tiled fallback for element counts not divisible by 128.

    Avoids any wrapper-side pad/slice (no extra HBM passes); the clipped last
    block handles the remainder.  Slightly lower in-VMEM lane/sublane
    efficiency than the 2-D path, but the op stays DMA-streaming.
    """
    n = flat.shape[0]
    grid = (pl.cdiv(n, _TILE_1D),)
    return pl.pallas_call(
        _identity_kernel,
        out_shape=jax.ShapeDtypeStruct(flat.shape, flat.dtype),
        grid=grid,
        in_specs=[pl.BlockSpec((_TILE_1D,), lambda i: (i,))],
        out_specs=pl.BlockSpec((_TILE_1D,), lambda i: (i,)),
        compiler_params=pltpu.CompilerParams(
            dimension_semantics=("parallel",),
        ),
    )(flat)


@jax.jit
def _pallas_identity(x):
    """Identity via Pallas on a lane-dense view of the input.

    No jnp.pad, no slice-back: reshapes of a contiguous array are
    metadata-only, so the op's HBM traffic is exactly read-N + write-N bytes.
    """
    orig_shape = x.shape
    n = x.size
    if n == 0:
        return x

    flat = x.reshape(-1)  # metadata-only reshape (contiguous)

    if n % _LANE == 0:
        x2 = flat.reshape(-1, _LANE)  # lane-dense slab, no padding needed
        rows = x2.shape[0]
        if rows <= _TILE_ROWS:
            y = _copy_whole(x2)       # tiny input: no grid, no pipeline cost
        else:
            y = _copy_tiled_2d(x2)    # clipped last block handles remainder
    else:
        # TODO(synk): element count not divisible by 128 — use the 1-D tiled
        # fallback (still zero extra HBM passes, just less lane-dense).
        if n <= _TILE_1D:
            y = _copy_whole(flat)
        else:
            y = _copy_tiled_1d(flat)

    return y.reshape(orig_shape)


class Model:
    """JAX/Pallas port of the reference nn.Module (no parameters, no compute).

    The reference forward only prints the input and its shape and returns
    None.  Because the identity copy's result would be discarded, the Pallas
    copy is gated behind `exercise_kernel` (off by default): skipping it
    removes a pure-overhead 2N-byte HBM round-trip per call on every TPU
    generation, which dwarfs any in-kernel tuning.
    """

    def __init__(self, exercise_kernel: bool = False):
        # Reference __init__ defines no parameters.
        self.exercise_kernel = exercise_kernel

    def forward(self, x):
        if self.exercise_kernel:
            # Debug/test path: run the bit-exact Pallas identity copy.
            _ = _pallas_identity(x)

        # Reproduce the reference side effects exactly: print the tensor and
        # its shape (the only device->host pull, outside the kernel).
        print(x)
        print(x.shape)

        # Reference forward returns None (no tensor output).
        return None

    __call__ = forward


if __name__ == "__main__":
    key = jax.random.PRNGKey(0)
    x = jax.random.normal(key, (2, 4, 16, 16), dtype=jnp.float32)

    # Reference semantics: print tensor + shape, return None (kernel skipped
    # in the hot path by default).
    model = Model()
    out = model(x)
    assert out is None  # matches PyTorch semantics (forward returns None)

    # Exercise the Pallas kernel explicitly, block, verify bit-exact identity.
    y = _pallas_identity(x)
    jax.block_until_ready(y)
    assert y.shape == x.shape and y.dtype == x.dtype
    assert bool(jnp.all(y == x))
    print("KERNEL_OK")
</pallas_src>

<mosaic_0001>
module attributes {stable_mosaic.version = 11 : i64} {
  func.func @_identity_kernel(%arg0: memref<16x128xf32, #tpu.memory_space<vmem>>, %arg1: memref<16x128xf32, #tpu.memory_space<vmem>>) attributes {dimension_semantics = [], scalar_prefetch = 0 : i64, scratch_operands = 0 : i64, tpu.core_type = #tpu.core_type<tc>} {
    %c0 = arith.constant 0 : index
    %c0_0 = arith.constant 0 : index
    %0 = vector.load %arg0[%c0, %c0_0] : memref<16x128xf32, #tpu.memory_space<vmem>>, vector<16x128xf32>
    %c0_1 = arith.constant 0 : index
    %c0_2 = arith.constant 0 : index
    %1 = vector.load %arg1[%c0_1, %c0_2] : memref<16x128xf32, #tpu.memory_space<vmem>>, vector<16x128xf32>
    tpu.vector_store %arg1[%c0_1, %c0_2], %0 {strides = array<i32>} : memref<16x128xf32, #tpu.memory_space<vmem>>, vector<16x128xf32>,
    return
  }
}

</mosaic_0001>

<bundles_post_ra>
// kernel: _pallas_identity.1
= control target key start
LH: loop header
LB: loop body
LE: loop exit
PB: predicated region body
PF: predicated region fallthrough
CT: control target
= control target key end

     0   :  { %s38_s0 = inlined_call_operand.vmem [shape: f32[16,128], index: 0, kind: input, shape index: {}]   ;;  %s39_s1 = inlined_call_operand.vmem [shape: f32[16,128], index: 1, kind: output, shape index: {}]  }
   0x1   :  { %v8_v0 = vld [vmem:[%s38_s0] sm:$0xff]  ;;  %v9_v1 = vld [vmem:[%s38_s0 + $0x8] sm:$0xff] }
   0x2   :  { %10 = vst [vmem:[%s39_s1] sm:$0xff] %v8_v0  ;;  %11 = vst [vmem:[%s39_s1 + $0x8] sm:$0xff] %v9_v1 }

</bundles_post_ra>
